<compile_context>
chip_gen: v7x
topology: tpu7x:2x2x1
jax: 0.10.0
libtpu: 0.0.40
codegen_flags: <defaults>
</compile_context>

<pallas_src>
import functools
import math

import jax
import jax.numpy as jnp
from jax.experimental import pallas as pl
from jax.experimental.pallas import tpu as pltpu

TC = 128                 # lane width
MAX_BLOCK_ROWS = 1024    # sublane rows per block (512 KiB f32 per stream)

_D = 1e-6
_LOGIT_LO = math.log(_D / (1.0 - _D))   # inv_sigmoid at the lower clamp
_LOGIT_HI = -_LOGIT_LO                  # inv_sigmoid at the upper clamp


def _mse_rel2_kernel(scal_ref, rel_ref, usr_ref, wt_ref, *rest, scalar_dur):
    if scalar_dur:
        out_ref, acc_sq, acc_cl, acc_ls, acc_co = rest
    else:
        dur_ref, out_ref, acc_sq, acc_cl, acc_ls, acc_co = rest

    i = pl.program_id(1)                       # reduction step for this core

    @pl.when(i == 0)
    def _():
        acc_sq[...] = jnp.zeros_like(acc_sq)
        acc_cl[...] = jnp.zeros_like(acc_cl)
        acc_ls[...] = jnp.zeros_like(acc_ls)
        acc_co[...] = jnp.zeros_like(acc_co)

    inv_eps = scal_ref[0]
    inv_2eps2 = scal_ref[1]

    rel = rel_ref[...]
    usr = usr_ref[...]
    wt = wt_ref[...]
    if scalar_dur:
        dur = scal_ref[2]
    else:
        dur = dur_ref[...]

    # inv_sigmoid(clamp(exp(-t), d, 1-d)) with fewer transcendentals:
    #   log(e / (1 - e)) == -t - log1p(-e)   for e = exp(-t)
    t = usr / (wt + 1.0)
    e = jnp.exp(-t)
    core = -t - jnp.log1p(-e)
    inv_sig = jnp.where(e <= _D, _LOGIT_LO,
                        jnp.where(e >= 1.0 - _D, _LOGIT_HI, core))

    diff = rel - inv_sig

    sq = diff * diff * inv_2eps2                        # squared-error branch
    z = diff * inv_eps                                  # logsigmoid branch
    neg_logsig = jnp.log1p(jnp.exp(-jnp.abs(z))) - jnp.minimum(z, 0.0)

    less = wt < dur          # NaN-padded tail is False in both branches
    over = wt >= dur

    zero = jnp.zeros_like(sq)
    acc_sq[...] += jnp.where(less, sq, zero)
    acc_cl[...] += less.astype(jnp.float32)
    acc_ls[...] += jnp.where(over, neg_logsig, zero)
    acc_co[...] += over.astype(jnp.float32)

    @pl.when(i == pl.num_programs(1) - 1)
    def _():
        # one cross-sublane reduce per quantity per core, then lane partials
        p_sq = jnp.sum(acc_sq[...], axis=0, keepdims=True)   # (1, 128)
        p_cl = jnp.sum(acc_cl[...], axis=0, keepdims=True)
        p_ls = jnp.sum(acc_ls[...], axis=0, keepdims=True)
        p_co = jnp.sum(acc_co[...], axis=0, keepdims=True)
        vals = jnp.concatenate([p_sq, p_cl, p_ls, p_co], axis=0)  # (4, 128)
        out_ref[...] = vals.reshape(1, 4, TC)


@jax.jit
def mse_rel2(rel_score, usr_score, wt, duration, eps):
    """Pallas implementation of MSE_rel2.forward. Returns a scalar f32 loss."""
    f32 = jnp.float32
    rel_score = jnp.asarray(rel_score)
    usr_score = jnp.asarray(usr_score)
    wt = jnp.asarray(wt)
    duration = jnp.asarray(duration)
    eps = jnp.asarray(eps, f32)

    scalar_dur = duration.size == 1     # keep scalar duration out of HBM stream

    shapes = [rel_score.shape, usr_score.shape, wt.shape]
    if not scalar_dur:
        shapes.append(duration.shape)
    shape = jnp.broadcast_shapes(*shapes)
    n = math.prod(shape) if shape else 1

    def _prep(x):
        x = x.astype(f32)
        if x.shape != shape:
            x = jnp.broadcast_to(x, shape)
        return x.reshape(-1)

    # tiling (all static Python ints under jit)
    rows = -(-n // TC)
    rows = -(-rows // 8) * 8
    block_rows = min(MAX_BLOCK_ROWS, rows)
    n_blocks = -(-rows // block_rows)
    n_par = 2 if n_blocks >= 2 else 1          # split reduction across 2 TCs (v7x)
    n_blocks = -(-n_blocks // n_par) * n_par
    n_steps = n_blocks // n_par
    total = n_blocks * block_rows * TC
    pad = total - n

    def _pad2d(x, fill):
        if pad:
            x = jnp.pad(x, (0, pad), constant_values=fill)
        return x.reshape(n_blocks * block_rows, TC)

    ins = [_pad2d(_prep(rel_score), 0.0),
           _pad2d(_prep(usr_score), 0.0),
           _pad2d(_prep(wt), float("nan"))]    # NaN tail -> excluded everywhere
    if not scalar_dur:
        ins.append(_pad2d(_prep(duration), 0.0))

    inv_eps = 1.0 / eps
    inv_2eps2 = 0.5 * inv_eps * inv_eps
    scal_list = [inv_eps, inv_2eps2]
    if scalar_dur:
        scal_list.append(duration.astype(f32).reshape(()))
    scal = jnp.stack(scal_list)

    tile_spec = pl.BlockSpec((block_rows, TC),
                             lambda c, i: (c * n_steps + i, 0))
    in_specs = [pl.BlockSpec(memory_space=pltpu.SMEM)] + [tile_spec] * len(ins)

    kernel = functools.partial(_mse_rel2_kernel, scalar_dur=scalar_dur)

    partials = pl.pallas_call(
        kernel,
        out_shape=jax.ShapeDtypeStruct((n_par, 4, TC), f32),
        grid=(n_par, n_steps),
        in_specs=in_specs,
        out_specs=pl.BlockSpec((1, 4, TC), lambda c, i: (c, 0, 0)),
        scratch_shapes=[pltpu.VMEM((block_rows, TC), f32) for _ in range(4)],
        compiler_params=pltpu.CompilerParams(
            dimension_semantics=("parallel", "arbitrary")),
    )(scal, *ins)

    tot = jnp.sum(partials, axis=(0, 2))       # (4,) tiny final reduction in JAX
    loss_less = tot[0] / tot[1]                # matches torch .mean(): NaN if empty
    loss_over = tot[2] / tot[3]
    return loss_less + loss_over


def _mse_rel2_ref(rel_score, usr_score, wt, duration, eps):
    """Pure-JAX reference mirroring the PyTorch module."""
    rel_true = jnp.exp(-usr_score / (wt + 1.0))
    d = 1e-6
    y = jnp.clip(rel_true, d, 1.0 - d)
    inv_sig = jnp.log(y / (1.0 - y))
    diff = rel_score - inv_sig

    less = wt < duration
    over = wt >= duration

    sq = (diff * diff) / (2.0 * eps ** 2)
    z = diff / eps
    logsig = jnp.minimum(z, 0.0) - jnp.log1p(jnp.exp(-jnp.abs(z)))

    loss_less = jnp.sum(jnp.where(less, sq, 0.0)) / jnp.sum(less)
    loss_over = jnp.sum(jnp.where(over, -logsig, 0.0)) / jnp.sum(over)
    return loss_less + loss_over


if __name__ == "__main__":
    key = jax.random.PRNGKey(0)
    k1, k2, k3, k4 = jax.random.split(key, 4)
    eps = 0.5

    # primary small test: batch=2, channels=4, spatial=16x16 (elementwise loss)
    shape = (2, 4, 16, 16)
    rel_score = jax.random.normal(k1, shape, dtype=jnp.float32)
    usr_score = jax.random.uniform(k2, shape, minval=0.0, maxval=5.0)
    wt = jax.random.uniform(k3, shape, minval=0.0, maxval=10.0)
    duration = jax.random.uniform(k4, shape, minval=0.0, maxval=10.0)

    out = jax.block_until_ready(mse_rel2(rel_score, usr_score, wt, duration, eps))
    ref = _mse_rel2_ref(rel_score, usr_score, wt, duration, eps)
    assert jnp.allclose(out, ref, rtol=1e-5, atol=1e-5), (out, ref)

    # ragged size (exercises NaN tail padding) + scalar duration via SMEM
    shape2 = (2, 3, 7, 5)
    r2 = jax.random.normal(k1, shape2, dtype=jnp.float32)
    u2 = jax.random.uniform(k2, shape2, minval=0.0, maxval=5.0)
    w2 = jax.random.uniform(k3, shape2, minval=0.0, maxval=10.0)
    out2 = jax.block_until_ready(mse_rel2(r2, u2, w2, 5.0, eps))
    ref2 = _mse_rel2_ref(r2, u2, w2, jnp.float32(5.0), eps)
    assert jnp.allclose(out2, ref2, rtol=1e-5, atol=1e-5), (out2, ref2)

    # multi-block (exercises 2-way core split + accumulation across steps)
    shape3 = (16, 8, 64, 64)    # 524288 elems -> 4 blocks of 1024x128
    r3 = jax.random.normal(k1, shape3, dtype=jnp.float32)
    u3 = jax.random.uniform(k2, shape3, minval=0.0, maxval=5.0)
    w3 = jax.random.uniform(k3, shape3, minval=0.0, maxval=10.0)
    d3 = jax.random.uniform(k4, shape3, minval=0.0, maxval=10.0)
    out3 = jax.block_until_ready(mse_rel2(r3, u3, w3, d3, eps))
    ref3 = _mse_rel2_ref(r3, u3, w3, d3, eps)
    assert jnp.allclose(out3, ref3, rtol=1e-4, atol=1e-5), (out3, ref3)

    print("KERNEL_OK")
</pallas_src>

<mosaic_0001>
module attributes {stable_mosaic.version = 11 : i64} {
  func.func @_mse_rel2_kernel(%arg0: i32, %arg1: i32, %arg2: memref<2xf32, #tpu.memory_space<smem>>, %arg3: memref<16x128xf32, #tpu.memory_space<vmem>>, %arg4: memref<16x128xf32, #tpu.memory_space<vmem>>, %arg5: memref<16x128xf32, #tpu.memory_space<vmem>>, %arg6: memref<16x128xf32, #tpu.memory_space<vmem>>, %arg7: memref<1x4x128xf32, #tpu.memory_space<vmem>>, %arg8: memref<16x128xf32, #tpu.memory_space<vmem>>, %arg9: memref<16x128xf32, #tpu.memory_space<vmem>>, %arg10: memref<16x128xf32, #tpu.memory_space<vmem>>, %arg11: memref<16x128xf32, #tpu.memory_space<vmem>>) attributes {dimension_semantics = [#tpu.dimension_semantics<parallel>, #tpu.dimension_semantics<arbitrary>], iteration_bounds = array<i64: 1, 1>, scalar_prefetch = 0 : i64, scratch_operands = 4 : i64, tpu.core_type = #tpu.core_type<tc>, window_params = [{transform_indices = @transform_0, window_bounds = array<i64: 2>}, {transform_indices = @transform_1, window_bounds = array<i64: 16, 128>}, {transform_indices = @transform_2, window_bounds = array<i64: 16, 128>}, {transform_indices = @transform_3, window_bounds = array<i64: 16, 128>}, {transform_indices = @transform_4, window_bounds = array<i64: 16, 128>}, {transform_indices = @transform_5, window_bounds = array<i64: 1, 4, 128>}]} {
    %c0_i32 = arith.constant 0 : i32
    %0 = arith.cmpi eq, %arg1, %c0_i32 : i32
    %1 = arith.extui %0 : i1 to i32
    %c0_i32_0 = arith.constant 0 : i32
    %2 = arith.cmpi ne, %1, %c0_i32_0 : i32
    scf.if %2 {
      %cst_37 = arith.constant 0.000000e+00 : f32
      %67 = vector.broadcast %cst_37 : f32 to vector<16x128xf32>
      %c0_38 = arith.constant 0 : index
      %c0_39 = arith.constant 0 : index
      %68 = vector.load %arg8[%c0_38, %c0_39] : memref<16x128xf32, #tpu.memory_space<vmem>>, vector<16x128xf32>
      tpu.vector_store %arg8[%c0_38, %c0_39], %67 {strides = array<i32>} : memref<16x128xf32, #tpu.memory_space<vmem>>, vector<16x128xf32>,
      %cst_40 = arith.constant 0.000000e+00 : f32
      %69 = vector.broadcast %cst_40 : f32 to vector<16x128xf32>
      %c0_41 = arith.constant 0 : index
      %c0_42 = arith.constant 0 : index
      %70 = vector.load %arg9[%c0_41, %c0_42] : memref<16x128xf32, #tpu.memory_space<vmem>>, vector<16x128xf32>
      tpu.vector_store %arg9[%c0_41, %c0_42], %69 {strides = array<i32>} : memref<16x128xf32, #tpu.memory_space<vmem>>, vector<16x128xf32>,
      %cst_43 = arith.constant 0.000000e+00 : f32
      %71 = vector.broadcast %cst_43 : f32 to vector<16x128xf32>
      %c0_44 = arith.constant 0 : index
      %c0_45 = arith.constant 0 : index
      %72 = vector.load %arg10[%c0_44, %c0_45] : memref<16x128xf32, #tpu.memory_space<vmem>>, vector<16x128xf32>
      tpu.vector_store %arg10[%c0_44, %c0_45], %71 {strides = array<i32>} : memref<16x128xf32, #tpu.memory_space<vmem>>, vector<16x128xf32>,
      %cst_46 = arith.constant 0.000000e+00 : f32
      %73 = vector.broadcast %cst_46 : f32 to vector<16x128xf32>
      %c0_47 = arith.constant 0 : index
      %c0_48 = arith.constant 0 : index
      %74 = vector.load %arg11[%c0_47, %c0_48] : memref<16x128xf32, #tpu.memory_space<vmem>>, vector<16x128xf32>
      tpu.vector_store %arg11[%c0_47, %c0_48], %73 {strides = array<i32>} : memref<16x128xf32, #tpu.memory_space<vmem>>, vector<16x128xf32>,
    } else {
    }
    %c0 = arith.constant 0 : index
    %3 = memref.load %arg2[%c0] : memref<2xf32, #tpu.memory_space<smem>>
    %c1 = arith.constant 1 : index
    %4 = memref.load %arg2[%c1] : memref<2xf32, #tpu.memory_space<smem>>
    %c0_1 = arith.constant 0 : index
    %c0_2 = arith.constant 0 : index
    %5 = vector.load %arg3[%c0_1, %c0_2] : memref<16x128xf32, #tpu.memory_space<vmem>>, vector<16x128xf32>
    %c0_3 = arith.constant 0 : index
    %c0_4 = arith.constant 0 : index
    %6 = vector.load %arg4[%c0_3, %c0_4] : memref<16x128xf32, #tpu.memory_space<vmem>>, vector<16x128xf32>
    %c0_5 = arith.constant 0 : index
    %c0_6 = arith.constant 0 : index
    %7 = vector.load %arg5[%c0_5, %c0_6] : memref<16x128xf32, #tpu.memory_space<vmem>>, vector<16x128xf32>
    %c0_7 = arith.constant 0 : index
    %c0_8 = arith.constant 0 : index
    %8 = vector.load %arg6[%c0_7, %c0_8] : memref<16x128xf32, #tpu.memory_space<vmem>>, vector<16x128xf32>
    %cst = arith.constant 1.000000e+00 : f32
    %9 = vector.broadcast %cst : f32 to vector<16x128xf32>
    %10 = arith.addf %7, %9 : vector<16x128xf32>
    %11 = arith.divf %6, %10 : vector<16x128xf32>
    %cst_9 = arith.constant 0.000000e+00 : f32
    %12 = vector.broadcast %cst_9 : f32 to vector<16x128xf32>
    %13 = arith.subf %12, %11 : vector<16x128xf32>
    %14 = math.exp %13 : vector<16x128xf32>
    %cst_10 = arith.constant 0.000000e+00 : f32
    %15 = vector.broadcast %cst_10 : f32 to vector<16x128xf32>
    %16 = arith.subf %15, %11 : vector<16x128xf32>
    %cst_11 = arith.constant 0.000000e+00 : f32
    %17 = vector.broadcast %cst_11 : f32 to vector<16x128xf32>
    %18 = arith.subf %17, %14 : vector<16x128xf32>
    %19 = math.log1p %18 : vector<16x128xf32>
    %20 = arith.subf %16, %19 : vector<16x128xf32>
    %cst_12 = arith.constant 9.99999997E-7 : f32
    %21 = vector.broadcast %cst_12 : f32 to vector<16x128xf32>
    %22 = arith.cmpf ole, %14, %21 : vector<16x128xf32>
    %cst_13 = arith.constant 0.999998986 : f32
    %23 = vector.broadcast %cst_13 : f32 to vector<16x128xf32>
    %24 = arith.cmpf oge, %14, %23 : vector<16x128xf32>
    %cst_14 = arith.constant 13.8155098 : f32
    %25 = vector.broadcast %cst_14 : f32 to vector<16x128xf32>
    %26 = arith.select %24, %25, %20 : vector<16x128xi1>, vector<16x128xf32>
    %cst_15 = arith.constant -13.8155098 : f32
    %27 = vector.broadcast %cst_15 : f32 to vector<16x128xf32>
    %28 = arith.select %22, %27, %26 : vector<16x128xi1>, vector<16x128xf32>
    %29 = arith.subf %5, %28 : vector<16x128xf32>
    %30 = arith.mulf %29, %29 : vector<16x128xf32>
    %31 = vector.broadcast %4 : f32 to vector<16x128xf32>
    %32 = arith.mulf %30, %31 : vector<16x128xf32>
    %33 = vector.broadcast %3 : f32 to vector<16x128xf32>
    %34 = arith.mulf %29, %33 : vector<16x128xf32>
    %35 = math.absf %34 : vector<16x128xf32>
    %cst_16 = arith.constant 0.000000e+00 : f32
    %36 = vector.broadcast %cst_16 : f32 to vector<16x128xf32>
    %37 = arith.subf %36, %35 : vector<16x128xf32>
    %38 = math.exp %37 : vector<16x128xf32>
    %39 = math.log1p %38 : vector<16x128xf32>
    %cst_17 = arith.constant 0.000000e+00 : f32
    %40 = vector.broadcast %cst_17 : f32 to vector<16x128xf32>
    %41 = arith.minimumf %34, %40 : vector<16x128xf32>
    %42 = arith.subf %39, %41 : vector<16x128xf32>
    %43 = arith.cmpf olt, %7, %8 : vector<16x128xf32>
    %44 = arith.cmpf oge, %7, %8 : vector<16x128xf32>
    %cst_18 = arith.constant 0.000000e+00 : f32
    %45 = vector.broadcast %cst_18 : f32 to vector<16x128xf32>
    %c0_19 = arith.constant 0 : index
    %c0_20 = arith.constant 0 : index
    %46 = vector.load %arg8[%c0_19, %c0_20] : memref<16x128xf32, #tpu.memory_space<vmem>>, vector<16x128xf32>
    %47 = arith.select %43, %32, %45 : vector<16x128xi1>, vector<16x128xf32>
    %48 = arith.addf %46, %47 : vector<16x128xf32>
    %c0_21 = arith.constant 0 : index
    %c0_22 = arith.constant 0 : index
    %49 = vector.load %arg8[%c0_21, %c0_22] : memref<16x128xf32, #tpu.memory_space<vmem>>, vector<16x128xf32>
    tpu.vector_store %arg8[%c0_21, %c0_22], %48 {strides = array<i32>} : memref<16x128xf32, #tpu.memory_space<vmem>>, vector<16x128xf32>,
    %c0_23 = arith.constant 0 : index
    %c0_24 = arith.constant 0 : index
    %50 = vector.load %arg9[%c0_23, %c0_24] : memref<16x128xf32, #tpu.memory_space<vmem>>, vector<16x128xf32>
    %51 = arith.extui %43 : vector<16x128xi1> to vector<16x128xi32>
    %52 = arith.sitofp %51 : vector<16x128xi32> to vector<16x128xf32>
    %53 = arith.addf %50, %52 : vector<16x128xf32>
    %c0_25 = arith.constant 0 : index
    %c0_26 = arith.constant 0 : index
    %54 = vector.load %arg9[%c0_25, %c0_26] : memref<16x128xf32, #tpu.memory_space<vmem>>, vector<16x128xf32>
    tpu.vector_store %arg9[%c0_25, %c0_26], %53 {strides = array<i32>} : memref<16x128xf32, #tpu.memory_space<vmem>>, vector<16x128xf32>,
    %c0_27 = arith.constant 0 : index
    %c0_28 = arith.constant 0 : index
    %55 = vector.load %arg10[%c0_27, %c0_28] : memref<16x128xf32, #tpu.memory_space<vmem>>, vector<16x128xf32>
    %56 = arith.select %44, %42, %45 : vector<16x128xi1>, vector<16x128xf32>
    %57 = arith.addf %55, %56 : vector<16x128xf32>
    %c0_29 = arith.constant 0 : index
    %c0_30 = arith.constant 0 : index
    %58 = vector.load %arg10[%c0_29, %c0_30] : memref<16x128xf32, #tpu.memory_space<vmem>>, vector<16x128xf32>
    tpu.vector_store %arg10[%c0_29, %c0_30], %57 {strides = array<i32>} : memref<16x128xf32, #tpu.memory_space<vmem>>, vector<16x128xf32>,
    %c0_31 = arith.constant 0 : index
    %c0_32 = arith.constant 0 : index
    %59 = vector.load %arg11[%c0_31, %c0_32] : memref<16x128xf32, #tpu.memory_space<vmem>>, vector<16x128xf32>
    %60 = arith.extui %44 : vector<16x128xi1> to vector<16x128xi32>
    %61 = arith.sitofp %60 : vector<16x128xi32> to vector<16x128xf32>
    %62 = arith.addf %59, %61 : vector<16x128xf32>
    %c0_33 = arith.constant 0 : index
    %c0_34 = arith.constant 0 : index
    %63 = vector.load %arg11[%c0_33, %c0_34] : memref<16x128xf32, #tpu.memory_space<vmem>>, vector<16x128xf32>
    tpu.vector_store %arg11[%c0_33, %c0_34], %62 {strides = array<i32>} : memref<16x128xf32, #tpu.memory_space<vmem>>, vector<16x128xf32>,
    %c0_i32_35 = arith.constant 0 : i32
    %64 = arith.cmpi eq, %arg1, %c0_i32_35 : i32
    %65 = arith.extui %64 : i1 to i32
    %c0_i32_36 = arith.constant 0 : i32
    %66 = arith.cmpi ne, %65, %c0_i32_36 : i32
    scf.if %66 {
      %c0_37 = arith.constant 0 : index
      %c0_38 = arith.constant 0 : index
      %67 = vector.load %arg8[%c0_37, %c0_38] : memref<16x128xf32, #tpu.memory_space<vmem>>, vector<16x128xf32>
      %cst_39 = arith.constant dense<0.000000e+00> : vector<128xf32>
      %68 = vector.multi_reduction <add>, %67, %cst_39 [0] : vector<16x128xf32> to vector<128xf32>
      %69 = vector.shape_cast %68 : vector<128xf32> to vector<1x128xf32>
      %c0_40 = arith.constant 0 : index
      %c0_41 = arith.constant 0 : index
      %70 = vector.load %arg9[%c0_40, %c0_41] : memref<16x128xf32, #tpu.memory_space<vmem>>, vector<16x128xf32>
      %cst_42 = arith.constant dense<0.000000e+00> : vector<128xf32>
      %71 = vector.multi_reduction <add>, %70, %cst_42 [0] : vector<16x128xf32> to vector<128xf32>
      %72 = vector.shape_cast %71 : vector<128xf32> to vector<1x128xf32>
      %c0_43 = arith.constant 0 : index
      %c0_44 = arith.constant 0 : index
      %73 = vector.load %arg10[%c0_43, %c0_44] : memref<16x128xf32, #tpu.memory_space<vmem>>, vector<16x128xf32>
      %cst_45 = arith.constant dense<0.000000e+00> : vector<128xf32>
      %74 = vector.multi_reduction <add>, %73, %cst_45 [0] : vector<16x128xf32> to vector<128xf32>
      %75 = vector.shape_cast %74 : vector<128xf32> to vector<1x128xf32>
      %c0_46 = arith.constant 0 : index
      %c0_47 = arith.constant 0 : index
      %76 = vector.load %arg11[%c0_46, %c0_47] : memref<16x128xf32, #tpu.memory_space<vmem>>, vector<16x128xf32>
      %cst_48 = arith.constant dense<0.000000e+00> : vector<128xf32>
      %77 = vector.multi_reduction <add>, %76, %cst_48 [0] : vector<16x128xf32> to vector<128xf32>
      %78 = vector.shape_cast %77 : vector<128xf32> to vector<1x128xf32>
      %79 = tpu.concatenate %69, %72, %75, %78 in 0 : vector<1x128xf32>, vector<1x128xf32>, vector<1x128xf32>, vector<1x128xf32> -> vector<4x128xf32>
      %80 = vector.shape_cast %79 : vector<4x128xf32> to vector<1x4x128xf32>
      %c0_49 = arith.constant 0 : index
      %c0_50 = arith.constant 0 : index
      %c0_51 = arith.constant 0 : index
      %81 = vector.load %arg7[%c0_49, %c0_50, %c0_51] : memref<1x4x128xf32, #tpu.memory_space<vmem>>, vector<1x4x128xf32>
      tpu.vector_store %arg7[%c0_49, %c0_50, %c0_51], %80 {strides = array<i32>} : memref<1x4x128xf32, #tpu.memory_space<vmem>>, vector<1x4x128xf32>,
    } else {
    }
    return
  }
  func.func @transform_0(%arg0: i32, %arg1: i32) -> i32 {
    %c0_i32 = arith.constant 0 : i32
    %c0_i32_0 = arith.constant 0 : i32
    return %c0_i32 : i32
  }
  func.func @transform_1(%arg0: i32, %arg1: i32) -> (i32, i32) {
    %c1_i32 = arith.constant 1 : i32
    %0 = arith.muli %arg0, %c1_i32 : i32
    %1 = arith.addi %0, %arg1 : i32
    %c0_i32 = arith.constant 0 : i32
    %c0_i32_0 = arith.constant 0 : i32
    return %1, %c0_i32 : i32, i32
  }
  func.func @transform_2(%arg0: i32, %arg1: i32) -> (i32, i32) {
    %c1_i32 = arith.constant 1 : i32
    %0 = arith.muli %arg0, %c1_i32 : i32
    %1 = arith.addi %0, %arg1 : i32
    %c0_i32 = arith.constant 0 : i32
    %c0_i32_0 = arith.constant 0 : i32
    return %1, %c0_i32 : i32, i32
  }
  func.func @transform_3(%arg0: i32, %arg1: i32) -> (i32, i32) {
    %c1_i32 = arith.constant 1 : i32
    %0 = arith.muli %arg0, %c1_i32 : i32
    %1 = arith.addi %0, %arg1 : i32
    %c0_i32 = arith.constant 0 : i32
    %c0_i32_0 = arith.constant 0 : i32
    return %1, %c0_i32 : i32, i32
  }
  func.func @transform_4(%arg0: i32, %arg1: i32) -> (i32, i32) {
    %c1_i32 = arith.constant 1 : i32
    %0 = arith.muli %arg0, %c1_i32 : i32
    %1 = arith.addi %0, %arg1 : i32
    %c0_i32 = arith.constant 0 : i32
    %c0_i32_0 = arith.constant 0 : i32
    return %1, %c0_i32 : i32, i32
  }
  func.func @transform_5(%arg0: i32, %arg1: i32) -> (i32, i32, i32) {
    %c0_i32 = arith.constant 0 : i32
    %c0_i32_0 = arith.constant 0 : i32
    %c0_i32_1 = arith.constant 0 : i32
    return %arg0, %c0_i32, %c0_i32_0 : i32, i32, i32
  }
}

</mosaic_0001>

<bundles_post_ra>
// kernel: mse_rel2.1
= control target key start
LH: loop header
LB: loop body
LE: loop exit
PB: predicated region body
PF: predicated region fallthrough
CT: control target
= control target key end

     0   :  { %10 = vsyncpa [#allocation7], 0  ;;  %s492_s0 = inlined_call_operand.vmem [shape: f32[2], index: 0, kind: input, shape index: {}]   ;;  %s493_s1 = inlined_call_operand.vmem [shape: f32[16,128], index: 1, kind: input, shape index: {}]   ;;  %s494_s2 = inlined_call_operand.vmem [shape: f32[16,128], index: 2, kind: input, shape index: {}]   ;;  %s495_s3 = inlined_call_operand.vmem [shape: f32[16,128], index: 3, kind: input, shape index: {}]   ;;  %s496_s4 = inlined_call_operand.vmem [shape: f32[16,128], index: 4, kind: input, shape index: {}]   ;;  %s497_s5 = inlined_call_operand.vmem [shape: f32[1,4,128], index: 5, kind: output, shape index: {}]  }
   0x1   :  { %s17_s20 = sshll.u32 %s492_s0, 4  ;;  %s18_s20 = int_to_ptr.vmem [resolvable:$true] %s17_s20 }
   0x2   :  { %s367_s21 = scalar_lea.vmem %s18_s20, 16  ;;  %p372_p1 = scmp.lt.s32.totalorder %s18_s20, %s18_s20 }
   0x3   :  { %p368_p0 = scmp.ne.s32.totalorder %s18_s20, %s367_s21  ;;  %p373_p2 = scmp.lt.s32.totalorder %s367_s21, %s367_s21 }
   0x5   :  { %p374_p3 = por %p373_p2, %p372_p1 }
   0x7   :  { %p375_p4 = pnand %p374_p3, %p368_p0 }
   0x9   :  { %378 = shalt.err (!%p375_p4)
}
   0xa   :  { %s381_s22 = smov [#allocation6]  }
   0xb   :  { %20 = dma.vmem_to_smem %s18_s20, 16, %s381_s22, [#allocation7]  }
   0xc   :  { %379 = dma.done.wait [#allocation7], 16  }
   0xd   :  { %380 = vsyncadd [#allocation7], 4294967280 }
   0xe   :  { %64 = sfence }
   0xf   :  { %v419_v0 = vld [vmem:[%s495_s3] sm:$0xff]  ;;  %v424_v1 = vld [vmem:[%s495_s3 + $0x8] sm:$0xff]  ;;  %v382_v6 = vmov 0.0   ;;  %s340_s7 = sld [smem:[#allocation6 + $0x1]]  ;;  %vm304_vm10 = vcmask 1040384   ;;  %vm306_vm13 = vcmask 1041408  }
  0x10   :  { %v429_v2 = vld [vmem:[%s496_s4] sm:$0xff]  ;;  %v434_v3 = vld [vmem:[%s496_s4 + $0x8] sm:$0xff]  ;;  %v143_v4 = vadd.f32 1.0, %v419_v0  ;;  %v144_v5 = vadd.f32 1.0, %v424_v1  ;;  %vm308_vm14 = vcmask 1042432  }
  0x11   :  { %vm225_vm0 = vcmp.lt.f32.partialorder %v419_v0, %v429_v2  ;;  %vm226_vm1 = vcmp.lt.f32.partialorder %v424_v1, %v434_v3  ;;  %vm227_vm2 = vcmp.ge.f32.partialorder %v419_v0, %v429_v2  ;;  %vm228_vm3 = vcmp.ge.f32.partialorder %v424_v1, %v434_v3  ;;  %v137_v13 = vld [vmem:[%s494_s2] sm:$0xff]  ;;  %v138_v14 = vld [vmem:[%s494_s2 + $0x8] sm:$0xff]  ;;  %s466_s2 = sld [smem:[#allocation6]] }
  0x12   :  { %347 = vrcp.f32 %v143_v4  ;;  %v341_v7 = vsel %vm225_vm0, 1.0, %v382_v6  ;;  %v342_v8 = vsel %vm226_vm1, 1.0, %v382_v6  ;;  %v343_v9 = vsel %vm227_vm2, 1.0, %v382_v6  ;;  %v135_v44 = vld [vmem:[%s493_s1] sm:$0xff]  ;;  %v136_v46 = vld [vmem:[%s493_s1 + $0x8] sm:$0xff] }
  0x13   :  { %349 = vrcp.f32 %v144_v5  ;;  %v344_v10 = vsel %vm228_vm3, 1.0, %v382_v6  ;;  %v279_v11 = vadd.f32 %v342_v8, %v341_v7 }
  0x14   :  { %v458_v12 = vadd.f32 %v344_v10, %v343_v9 }
  0x15   :  { %v280_v48 = vrot.slane %v279_v11, 4  ;;  %v189_v55 = vstv %s340_s7 }
  0x17   :  { %v192_v51 = vstv %s466_s2  ;;  %v281_v58 = vadd.f32 %v280_v48, %v279_v11 }
  0x19   :  { %v282_v7 = vrot.slane %v281_v58, 2 }
  0x1c   :  { %v348_v15 = vpop.eup %347 }
  0x1d   :  { %v350_v16 = vpop.eup %349  ;;  %v146_v17 = vmul.f32 %v348_v15, %v137_v13  ;;  %v283_v15 = vadd.f32 %v282_v7, %v281_v58 }
  0x1e   :  { %v148_v18 = vmul.f32 %v350_v16, %v138_v14 }
  0x1f   :  { %v149_v19 = vsub.f32 0.0, %v146_v17 }
  0x20   :  { %v150_v20 = vsub.f32 0.0, %v148_v18  ;;  %v284_v18 = vrot.slane %v283_v15, 1 }
  0x21   :  { %v151_v21 = vmul.f32 1.442695, %v149_v19 }
  0x22   :  { %v153_v22 = vmul.f32 1.442695, %v150_v20 }
  0x23   :  { %351 = vpow2.f32 %v151_v21  ;;  %v285_v21 = vadd.f32 %v284_v18, %v283_v15 }
  0x24   :  { %353 = vpow2.f32 %v153_v22 }
  0x2d   :  { %v352_v23 = vpop.eup %351 }
  0x2e   :  { %v354_v24 = vpop.eup %353  ;;  %v155_v25 = vsub.f32 0.0, %v352_v23  ;;  %vm179_vm6 = vcmp.ge.f32.partialorder %v352_v23, 0.999999  ;;  %vm177_vm7 = vcmp.le.f32.partialorder %v352_v23, 1e-06 }
  0x2f   :  { %v156_v26 = vsub.f32 0.0, %v354_v24  ;;  %vm180_vm8 = vcmp.ge.f32.partialorder %v354_v24, 0.999999  ;;  %vm178_vm9 = vcmp.le.f32.partialorder %v354_v24, 1e-06 }
  0x30   :  { %v157_v27 = vadd.f32 1.0, %v155_v25  ;;  %v160_v29 = vmul.f32 -0.5, %v155_v25  ;;  %v163_v32 = vand.u32 2147483647, %v155_v25 }
  0x31   :  { %v166_v28 = vadd.f32 1.0, %v156_v26  ;;  %v169_v30 = vmul.f32 -0.5, %v156_v26  ;;  %v172_v34 = vand.u32 2147483647, %v156_v26 }
  0x32   :  { %355 = vlog2.f32 %v157_v27  ;;  %v161_v31 = vadd.f32 1.0, %v160_v29  ;;  %vm164_vm4 = vcmp.lt.f32.partialorder %v163_v32, 0.0004427343 }
  0x33   :  { %357 = vlog2.f32 %v166_v28  ;;  %v170_v33 = vadd.f32 1.0, %v169_v30  ;;  %vm173_vm5 = vcmp.lt.f32.partialorder %v172_v34, 0.0004427343 }
  0x34   :  { %v162_v35 = vmul.f32 %v161_v31, %v155_v25 }
  0x35   :  { %v171_v37 = vmul.f32 %v170_v33, %v156_v26 }
  0x3c   :  { %v356_v36 = vpop.eup %355 }
  0x3d   :  { %v358_v38 = vpop.eup %357  ;;  %v159_v39 = vmul.f32 0.6931472, %v356_v36 }
  0x3e   :  { %v168_v40 = vmul.f32 0.6931472, %v358_v38 }
  0x3f   :  { %v165_v41 = vsel %vm164_vm4, %v162_v35, %v159_v39  ;;  %v298_v35 = vrot.slane %v458_v12, 4 }
  0x40   :  { %v174_v42 = vsel %vm173_vm5, %v171_v37, %v168_v40  ;;  %v175_v43 = vsub.f32 %v149_v19, %v165_v41 }
  0x41   :  { %v176_v45 = vsub.f32 %v150_v20, %v174_v42 }
  0x42   :  { %v181_v47 = vsel %vm179_vm6, 13.81551, %v175_v43 }
  0x43   :  { %v182_v49 = vsel %vm180_vm8, 13.81551, %v176_v45  ;;  %v183_v50 = vsel %vm177_vm7, -13.81551, %v181_v47 }
  0x44   :  { %v184_v52 = vsel %vm178_vm9, -13.81551, %v182_v49  ;;  %v185_v53 = vsub.f32 %v135_v44, %v183_v50  ;;  %v299_v44 = vadd.f32 %v298_v35, %v458_v12 }
  0x45   :  { %v186_v54 = vsub.f32 %v136_v46, %v184_v52 }
  0x46   :  { %v187_v56 = vmul.f32 %v185_v53, %v185_v53  ;;  %v193_v57 = vmul.f32 %v192_v51, %v185_v53  ;;  %v300_v50 = vrot.slane %v299_v44, 2 }
  0x47   :  { %v188_v59 = vmul.f32 %v186_v54, %v186_v54  ;;  %v194_v60 = vmul.f32 %v192_v51, %v186_v54 }
  0x48   :  { %v190_v61 = vmul.f32 %v189_v55, %v187_v56  ;;  %v195_v62 = vand.u32 2147483647, %v193_v57  ;;  %v221_v38 = vmin.f32 %v193_v57, 0.0  ;;  %v301_v53 = vadd.f32 %v300_v50, %v299_v44 }
  0x49   :  { %v191_v63 = vmul.f32 %v189_v55, %v188_v59  ;;  %v196_v4 = vand.u32 2147483647, %v194_v60  ;;  %v222_v41 = vmin.f32 %v194_v60, 0.0 }
  0x4a   :  { %v197_v5 = vsub.f32 0.0, %v195_v62  ;;  %v231_v6 = vsel %vm225_vm0, %v190_v61, 0.0  ;;  %v302_v56 = vrot.slane %v301_v53, 1 }
  0x4b   :  { %v198_v8 = vsub.f32 0.0, %v196_v4  ;;  %v232_v9 = vsel %vm226_vm1, %v191_v63, 0.0 }
  0x4c   :  { %v199_v10 = vmul.f32 1.442695, %v197_v5  ;;  %v270_v13 = vadd.f32 %v232_v9, %v231_v6  ;;  %v303_v58 = vadd.f32 %v302_v56, %v301_v53 }
  0x4d   :  { %v201_v11 = vmul.f32 1.442695, %v198_v8 }
  0x4e   :  { %359 = vpow2.f32 %v199_v10  ;;  %v271_v14 = vrot.slane %v270_v13, 4 }
  0x4f   :  { %361 = vpow2.f32 %v201_v11 }
  0x50   :  { %v272_v16 = vadd.f32 %v271_v14, %v270_v13 }
  0x52   :  { %v273_v17 = vrot.slane %v272_v16, 2 }
  0x54   :  { %v274_v19 = vadd.f32 %v273_v17, %v272_v16 }
  0x56   :  { %v275_v20 = vrot.slane %v274_v19, 1 }
  0x58   :  { %v360_v22 = vpop.eup %359  ;;  %v276_v23 = vadd.f32 %v275_v20, %v274_v19 }
  0x59   :  { %v362_v24 = vpop.eup %361  ;;  %v203_v25 = vadd.f32 1.0, %v360_v22  ;;  %v206_v28 = vmul.f32 -0.5, %v360_v22  ;;  %v209_v31 = vand.u32 2147483647, %v360_v22 }
  0x5a   :  { %v212_v26 = vadd.f32 1.0, %v362_v24  ;;  %v305_v27 = vsel %vm304_vm10, %v276_v23, %v285_v21  ;;  %v215_v29 = vmul.f32 -0.5, %v362_v24  ;;  %v218_v33 = vand.u32 2147483647, %v362_v24 }
  0x5b   :  { %363 = vlog2.f32 %v203_v25  ;;  %v207_v30 = vadd.f32 1.0, %v206_v28  ;;  %vm210_vm11 = vcmp.lt.f32.partialorder %v209_v31, 0.0004427343 }
  0x5c   :  { %365 = vlog2.f32 %v212_v26  ;;  %v216_v32 = vadd.f32 1.0, %v215_v29  ;;  %vm219_vm12 = vcmp.lt.f32.partialorder %v218_v33, 0.0004427343 }
  0x5d   :  { %v208_v34 = vmul.f32 %v360_v22, %v207_v30 }
  0x5e   :  { %v217_v37 = vmul.f32 %v362_v24, %v216_v32 }
  0x65   :  { %v364_v36 = vpop.eup %363 }
  0x66   :  { %v366_v39 = vpop.eup %365  ;;  %v205_v40 = vmul.f32 0.6931472, %v364_v36 }
  0x67   :  { %v214_v42 = vmul.f32 0.6931472, %v366_v39 }
  0x68   :  { %v211_v43 = vsel %vm210_vm11, %v208_v34, %v205_v40 }
  0x69   :  { %v220_v45 = vsel %vm219_vm12, %v217_v37, %v214_v42  ;;  %v223_v46 = vsub.f32 %v211_v43, %v221_v38 }
  0x6a   :  { %v224_v47 = vsub.f32 %v220_v45, %v222_v41 }
  0x6b   :  { %v249_v48 = vsel %vm227_vm2, %v223_v46, 0.0 }
  0x6c   :  { %v250_v49 = vsel %vm228_vm3, %v224_v47, 0.0 }
  0x6d   :  { %v288_v51 = vadd.f32 %v250_v49, %v249_v48 }
  0x6f   :  { %v289_v52 = vrot.slane %v288_v51, 4 }
  0x71   :  { %v290_v54 = vadd.f32 %v289_v52, %v288_v51 }
  0x73   :  { %v291_v55 = vrot.slane %v290_v54, 2 }
  0x75   :  { %v292_v57 = vadd.f32 %v291_v55, %v290_v54 }
  0x77   :  { %v293_v12 = vrot.slane %v292_v57, 1 }
  0x79   :  { %v294_v59 = vadd.f32 %v293_v12, %v292_v57 }
  0x7b   :  { %v307_v60 = vsel %vm306_vm13, %v305_v27, %v294_v59 }
  0x7c   :  { %v309_v0 = vsel %vm308_vm14, %v307_v60, %v303_v58 }
  0x7d   :  { %310 = vst [vmem:[%s497_s5] sm:$0xf] %v309_v0 }
  0x7e   :  { %315 = vsyncpa [#allocation7], 1 }

</bundles_post_ra>
